<compile_context>
chip_gen: v6e
topology: v6e:2x2x1
jax: 0.10.0
libtpu: 0.0.40
codegen_flags: <defaults>
</compile_context>

<pallas_src>
import math

import jax
import jax.numpy as jnp
from jax.experimental import pallas as pl
from jax.experimental.pallas import tpu as pltpu

EPS = 1e-5


# ------------------------------ shared math -------------------------------- #

def _rmsnorm(x, w):
    # torch: norm = sqrt(mean(x^2, -1)) + eps ; y = x / norm * w   (kept in f32)
    norm = jnp.sqrt(jnp.mean(x * x, axis=-1, keepdims=True)) + EPS
    return x / norm * w


# --------------------- fused whole-model decoder kernel --------------------- #

def make_decoder_kernel(num_heads):
    """Grid = (batch, layer). Output block (the residual stream) is resident and
    revisited across the layer axis; per-layer weights stream along that axis."""

    def kernel(x_ref, ln1_ref, wqkv_ref, wo_ref, ln2_ref, wgu_ref, wd_ref,
               normw_ref, o_ref):
        l = pl.program_id(1)
        last = pl.num_programs(1) - 1
        S, D = x_ref.shape
        hd = D // num_heads
        hidden = wd_ref.shape[0]
        scale = 1.0 / math.sqrt(hd)

        # layer 0: seed the resident residual stream with the embeddings.
        @pl.when(l == 0)
        def _init():
            o_ref[...] = x_ref[...]

        x = o_ref[...]                                              # (S, D) f32

        # ---- attention block -------------------------------------------------
        hn = _rmsnorm(x, ln1_ref[...]).astype(jnp.bfloat16)          # (S, D) bf16
        # fused Q|K|V projection: one MXU pass against the (D, 3D) slab.
        qkv = jnp.dot(hn, wqkv_ref[...],
                      preferred_element_type=jnp.float32)            # (S, 3D) f32

        att = jnp.zeros((S, D), jnp.float32)
        for h in range(num_heads):                                   # static unroll
            q = qkv[:, h * hd:(h + 1) * hd].astype(jnp.bfloat16)
            k = qkv[:, D + h * hd:D + (h + 1) * hd].astype(jnp.bfloat16)
            v = qkv[:, 2 * D + h * hd:2 * D + (h + 1) * hd].astype(jnp.bfloat16)

            scores = jax.lax.dot_general(
                q, k, (((1,), (1,)), ((), ())),
                preferred_element_type=jnp.float32) * scale           # (S, S) f32
            m = jnp.max(scores, axis=-1, keepdims=True)
            e = jnp.exp(scores - m)
            attn = e / jnp.sum(e, axis=-1, keepdims=True)

            ctx = jnp.dot(attn.astype(jnp.bfloat16), v,
                          preferred_element_type=jnp.float32)         # (S, hd) f32
            # per-head output-projection rows: wo_ref is (H, hd, D)
            att = att + jnp.dot(ctx.astype(jnp.bfloat16), wo_ref[h],
                                preferred_element_type=jnp.float32)   # (S, D) f32
        x = x + att                                                   # residual

        # ---- MLP block --------------------------------------------------------
        h2 = _rmsnorm(x, ln2_ref[...]).astype(jnp.bfloat16)
        # fused gate|up projection: one MXU pass against the (D, 2*hidden) slab.
        gu = jnp.dot(h2, wgu_ref[...],
                     preferred_element_type=jnp.float32)              # (S, 2*hidden)
        prod = gu[:, :hidden] * gu[:, hidden:]                        # gate * up
        act = prod * jax.nn.sigmoid(prod)                             # SiLU(gate*up)
        down = jnp.dot(act.astype(jnp.bfloat16), wd_ref[...],
                       preferred_element_type=jnp.float32)            # (S, D)
        x = x + down                                                  # residual

        o_ref[...] = x

        # last layer: apply the final model RMSNorm in place.
        @pl.when(l == last)
        def _final():
            o_ref[...] = _rmsnorm(x, normw_ref[...])

    return kernel


def llama_forward(ids, embed, stacked, norm_w, *, num_heads):
    x = embed[ids]                                    # embedding gather: plain-JAX glue
    B, S, D = x.shape
    L, _, three_d = stacked['wqkv'].shape
    hd = D // num_heads
    hidden = stacked['wd'].shape[1]
    two_h = 2 * hidden

    return pl.pallas_call(
        make_decoder_kernel(num_heads),
        out_shape=jax.ShapeDtypeStruct((B, S, D), jnp.float32),
        grid=(B, L),
        in_specs=[
            pl.BlockSpec((None, S, D), lambda b, l: (b, 0, 0)),            # x (per batch)
            pl.BlockSpec((None, 1, D), lambda b, l: (l, 0, 0)),            # ln1
            pl.BlockSpec((None, D, three_d), lambda b, l: (l, 0, 0)),      # fused QKV
            pl.BlockSpec((None, num_heads, hd, D), lambda b, l: (l, 0, 0, 0)),  # per-head o-proj
            pl.BlockSpec((None, 1, D), lambda b, l: (l, 0, 0)),            # ln2
            pl.BlockSpec((None, D, two_h), lambda b, l: (l, 0, 0)),        # fused gate|up
            pl.BlockSpec((None, hidden, D), lambda b, l: (l, 0, 0)),       # down proj
            pl.BlockSpec((1, D), lambda b, l: (0, 0)),                     # final norm weight
        ],
        out_specs=pl.BlockSpec((None, S, D), lambda b, l: (b, 0, 0)),      # residual stream
        compiler_params=pltpu.CompilerParams(
            dimension_semantics=("parallel", "arbitrary")),
    )(x, stacked['ln1'], stacked['wqkv'], stacked['wo_h'], stacked['ln2'],
      stacked['wgu'], stacked['wd'], norm_w)


# ------------------------- one-time weight re-layout ------------------------ #

def prepare_stacked_params(layers, num_heads):
    """Offline weight re-layout + bf16 cast; stacked along a leading layer axis so the
    single fused kernel can stream layer l's weights while computing layer l-1."""
    D = layers[0]['wq'].shape[0]
    hd = D // num_heads
    wqkv = jnp.stack([jnp.concatenate([p['wq'], p['wk'], p['wv']], axis=-1)
                      for p in layers]).astype(jnp.bfloat16)          # (L, D, 3D)
    wo_h = jnp.stack([p['wo'].reshape(num_heads, hd, D)
                      for p in layers]).astype(jnp.bfloat16)           # (L, H, hd, D)
    wgu = jnp.stack([jnp.concatenate([p['w_gate'], p['w_up']], axis=-1)
                     for p in layers]).astype(jnp.bfloat16)            # (L, D, 2*hidden)
    wd = jnp.stack([p['w_down'] for p in layers]).astype(jnp.bfloat16)  # (L, hidden, D)
    ln1 = jnp.stack([p['ln1'] for p in layers])                         # (L, 1, D) f32
    ln2 = jnp.stack([p['ln2'] for p in layers])                         # (L, 1, D) f32
    return dict(wqkv=wqkv, wo_h=wo_h, wgu=wgu, wd=wd, ln1=ln1, ln2=ln2)


# ----------------------- deterministic parameter init ----------------------- #

def init_params(key, vocab, dim, num_layers, hidden):
    keys = jax.random.split(key, 1 + num_layers)
    embed = jax.random.normal(keys[0], (vocab, dim), jnp.float32)   # nn.Embedding ~ N(0,1)
    s_d = 1.0 / math.sqrt(dim)
    s_h = 1.0 / math.sqrt(hidden)
    layers = []
    for l in range(num_layers):
        ks = jax.random.split(keys[1 + l], 7)
        layers.append(dict(
            wq=jax.random.uniform(ks[0], (dim, dim), jnp.float32, -s_d, s_d),
            wk=jax.random.uniform(ks[1], (dim, dim), jnp.float32, -s_d, s_d),
            wv=jax.random.uniform(ks[2], (dim, dim), jnp.float32, -s_d, s_d),
            wo=jax.random.uniform(ks[3], (dim, dim), jnp.float32, -s_d, s_d),
            w_gate=jax.random.uniform(ks[4], (dim, hidden), jnp.float32, -s_d, s_d),
            w_up=jax.random.uniform(ks[5], (dim, hidden), jnp.float32, -s_d, s_d),
            w_down=jax.random.uniform(ks[6], (hidden, dim), jnp.float32, -s_h, s_h),
            ln1=jnp.ones((1, dim), jnp.float32),
            ln2=jnp.ones((1, dim), jnp.float32),
        ))
    norm_w = jnp.ones((1, dim), jnp.float32)
    return embed, layers, norm_w


# ----------------------------- pure-JAX reference ---------------------------- #

def ref_forward(ids, embed, layers, norm_w, num_heads, mxu_dtype=jnp.float32):
    """mxu_dtype=f32: exact module semantics; bf16: mirrors the kernel's MXU casts."""
    def mm(a, b):
        return jnp.dot(a.astype(mxu_dtype), b.astype(mxu_dtype),
                       preferred_element_type=jnp.float32)

    x = embed[ids]
    B, S, D = x.shape
    hd = D // num_heads
    for p in layers:
        h = _rmsnorm(x, p['ln1'])
        q = mm(h, p['wq']).reshape(B, S, num_heads, hd).transpose(0, 2, 1, 3)
        k = mm(h, p['wk']).reshape(B, S, num_heads, hd).transpose(0, 2, 1, 3)
        v = mm(h, p['wv']).reshape(B, S, num_heads, hd).transpose(0, 2, 1, 3)
        scores = jnp.einsum('bhqd,bhkd->bhqk', q.astype(mxu_dtype), k.astype(mxu_dtype),
                            preferred_element_type=jnp.float32) / math.sqrt(hd)
        attn = jax.nn.softmax(scores, axis=-1)
        ctx = jnp.einsum('bhqk,bhkd->bhqd', attn.astype(mxu_dtype), v.astype(mxu_dtype),
                         preferred_element_type=jnp.float32)
        ctx = ctx.transpose(0, 2, 1, 3).reshape(B, S, D)
        x = x + mm(ctx, p['wo'])
        h = _rmsnorm(x, p['ln2'])
        prod = mm(h, p['w_gate']) * mm(h, p['w_up'])
        x = x + mm(prod * jax.nn.sigmoid(prod), p['w_down'])
    return _rmsnorm(x, norm_w)


# ----------------------------------- main ------------------------------------ #

if __name__ == "__main__":
    VOCAB, DIM, NUM_LAYERS, HIDDEN, NUM_HEADS = 64, 32, 2, 64, 4
    BATCH, SEQ = 2, 8

    key = jax.random.PRNGKey(0)
    k_params, k_ids = jax.random.split(key)
    embed, layers, norm_w = init_params(k_params, VOCAB, DIM, NUM_LAYERS, HIDDEN)
    ids = jax.random.randint(k_ids, (BATCH, SEQ), 0, VOCAB, dtype=jnp.int32)

    # one-time weight re-layout OUTSIDE jit (previously re-done inside every forward)
    stacked = prepare_stacked_params(layers, NUM_HEADS)

    fwd = jax.jit(llama_forward, static_argnames='num_heads')
    out = jax.block_until_ready(fwd(ids, embed, stacked, norm_w, num_heads=NUM_HEADS))
    assert out.shape == (BATCH, SEQ, DIM)

    # (1) tight parity vs a reference that mirrors the kernel's bf16-in / f32-acc MXU math
    ref_mixed = jax.block_until_ready(
        ref_forward(ids, embed, layers, norm_w, NUM_HEADS, mxu_dtype=jnp.bfloat16))
    err_mixed = float(jnp.max(jnp.abs(out - ref_mixed)))
    assert err_mixed < 5e-3, f"mixed-precision parity check failed: {err_mixed}"

    # (2) semantic check vs the pure-f32 module (slack covers bf16 MXU-input rounding)
    ref_f32 = jax.block_until_ready(
        ref_forward(ids, embed, layers, norm_w, NUM_HEADS, mxu_dtype=jnp.float32))
    err_f32 = float(jnp.max(jnp.abs(out - ref_f32)))
    rel = err_f32 / (float(jnp.max(jnp.abs(ref_f32))) + 1e-6)
    assert rel < 0.1, f"semantic check vs f32 reference failed: abs={err_f32} rel={rel}"

    print("KERNEL_OK")
</pallas_src>

<mosaic_0001>
module attributes {stable_mosaic.version = 11 : i64} {
  func.func @kernel(%arg0: i32, %arg1: i32, %arg2: memref<1x8x32xf32, #tpu.memory_space<vmem>>, %arg3: memref<1x1x32xf32, #tpu.memory_space<vmem>>, %arg4: memref<1x32x96xbf16, #tpu.memory_space<vmem>>, %arg5: memref<1x4x8x32xbf16, #tpu.memory_space<vmem>>, %arg6: memref<1x1x32xf32, #tpu.memory_space<vmem>>, %arg7: memref<1x32x128xbf16, #tpu.memory_space<vmem>>, %arg8: memref<1x64x32xbf16, #tpu.memory_space<vmem>>, %arg9: memref<1x32xf32, #tpu.memory_space<vmem>>, %arg10: memref<1x8x32xf32, #tpu.memory_space<vmem>>) attributes {dimension_semantics = [#tpu.dimension_semantics<parallel>, #tpu.dimension_semantics<arbitrary>], iteration_bounds = array<i64: 2, 2>, scalar_prefetch = 0 : i64, scratch_operands = 0 : i64, tpu.core_type = #tpu.core_type<tc>, window_params = [{transform_indices = @transform_0, window_bounds = array<i64: 1, 8, 32>}, {transform_indices = @transform_1, window_bounds = array<i64: 1, 1, 32>}, {transform_indices = @transform_2, window_bounds = array<i64: 1, 32, 96>}, {transform_indices = @transform_3, window_bounds = array<i64: 1, 4, 8, 32>}, {transform_indices = @transform_4, window_bounds = array<i64: 1, 1, 32>}, {transform_indices = @transform_5, window_bounds = array<i64: 1, 32, 128>}, {transform_indices = @transform_6, window_bounds = array<i64: 1, 64, 32>}, {pipeline_mode = #tpu.pipeline_mode<synchronous>, transform_indices = @transform_7, window_bounds = array<i64: 1, 32>}, {transform_indices = @transform_8, window_bounds = array<i64: 1, 8, 32>}]} {
    %c0_i32 = arith.constant 0 : i32
    %0 = arith.cmpi eq, %arg1, %c0_i32 : i32
    %1 = arith.extui %0 : i1 to i32
    %c0_i32_0 = arith.constant 0 : i32
    %2 = arith.cmpi ne, %1, %c0_i32_0 : i32
    scf.if %2 {
      %c0_69 = arith.constant 0 : index
      %c0_70 = arith.constant 0 : index
      %c0_71 = arith.constant 0 : index
      %163 = vector.load %arg2[%c0_69, %c0_70, %c0_71] : memref<1x8x32xf32, #tpu.memory_space<vmem>>, vector<1x8x32xf32>
      %164 = vector.shape_cast %163 : vector<1x8x32xf32> to vector<8x32xf32>
      %c0_72 = arith.constant 0 : index
      %c0_73 = arith.constant 0 : index
      %c0_74 = arith.constant 0 : index
      %165 = vector.load %arg10[%c0_72, %c0_73, %c0_74] : memref<1x8x32xf32, #tpu.memory_space<vmem>>, vector<1x8x32xf32>
      %166 = vector.shape_cast %165 : vector<1x8x32xf32> to vector<8x32xf32>
      %167 = vector.shape_cast %164 : vector<8x32xf32> to vector<1x8x32xf32>
      tpu.vector_store %arg10[%c0_72, %c0_73, %c0_74], %167 {strides = array<i32>} : memref<1x8x32xf32, #tpu.memory_space<vmem>>, vector<1x8x32xf32>,
    } else {
    }
    %c0 = arith.constant 0 : index
    %c0_1 = arith.constant 0 : index
    %c0_2 = arith.constant 0 : index
    %3 = vector.load %arg10[%c0, %c0_1, %c0_2] : memref<1x8x32xf32, #tpu.memory_space<vmem>>, vector<1x8x32xf32>
    %4 = vector.shape_cast %3 : vector<1x8x32xf32> to vector<8x32xf32>
    %c0_3 = arith.constant 0 : index
    %c0_4 = arith.constant 0 : index
    %c0_5 = arith.constant 0 : index
    %5 = vector.load %arg3[%c0_3, %c0_4, %c0_5] : memref<1x1x32xf32, #tpu.memory_space<vmem>>, vector<1x1x32xf32>
    %6 = vector.shape_cast %5 : vector<1x1x32xf32> to vector<1x32xf32>
    %7 = arith.mulf %4, %4 : vector<8x32xf32>
    %cst = arith.constant dense<0.000000e+00> : vector<8xf32>
    %8 = vector.multi_reduction <add>, %7, %cst [1] : vector<8x32xf32> to vector<8xf32>
    %9 = vector.shape_cast %8 : vector<8xf32> to vector<8x1xf32>
    %cst_6 = arith.constant 3.200000e+01 : f32
    %10 = vector.broadcast %cst_6 : f32 to vector<8x1xf32>
    %11 = arith.divf %9, %10 : vector<8x1xf32>
    %12 = math.sqrt %11 : vector<8x1xf32>
    %cst_7 = arith.constant 9.99999974E-6 : f32
    %13 = vector.broadcast %cst_7 : f32 to vector<8x1xf32>
    %14 = arith.addf %12, %13 : vector<8x1xf32>
    %15 = vector.broadcast %14 : vector<8x1xf32> to vector<8x32xf32>
    %16 = arith.divf %4, %15 : vector<8x32xf32>
    %17 = vector.broadcast %6 : vector<1x32xf32> to vector<8x32xf32>
    %18 = arith.mulf %16, %17 : vector<8x32xf32>
    %19 = arith.truncf %18 : vector<8x32xf32> to vector<8x32xbf16>
    %c0_8 = arith.constant 0 : index
    %c0_9 = arith.constant 0 : index
    %c0_10 = arith.constant 0 : index
    %20 = vector.load %arg4[%c0_8, %c0_9, %c0_10] : memref<1x32x96xbf16, #tpu.memory_space<vmem>>, vector<1x32x96xbf16>
    %21 = vector.shape_cast %20 : vector<1x32x96xbf16> to vector<32x96xbf16>
    %cst_11 = arith.constant dense<0.000000e+00> : vector<8x96xf32>
    %22 = tpu.matmul %19, %21, %cst_11 {dimension_numbers = #tpu.dot_dimension_numbers<[1], [0], [0], [1], [0, 0, 1, 1], [], []>} : vector<8x32xbf16>, vector<32x96xbf16>, vector<8x96xf32> -> vector<8x96xf32>
    %cst_12 = arith.constant 0.000000e+00 : f32
    %23 = vector.broadcast %cst_12 : f32 to vector<8x32xf32>
    %24 = vector.extract_strided_slice %22 {offsets = [0, 0], sizes = [8, 8], strides = [1, 1]} : vector<8x96xf32> to vector<8x8xf32>
    %25 = arith.truncf %24 : vector<8x8xf32> to vector<8x8xbf16>
    %26 = vector.extract_strided_slice %22 {offsets = [0, 32], sizes = [8, 8], strides = [1, 1]} : vector<8x96xf32> to vector<8x8xf32>
    %27 = arith.truncf %26 : vector<8x8xf32> to vector<8x8xbf16>
    %28 = vector.extract_strided_slice %22 {offsets = [0, 64], sizes = [8, 8], strides = [1, 1]} : vector<8x96xf32> to vector<8x8xf32>
    %29 = arith.truncf %28 : vector<8x8xf32> to vector<8x8xbf16>
    %cst_13 = arith.constant dense<0.000000e+00> : vector<8x8xf32>
    %30 = tpu.matmul %25, %27, %cst_13 {dimension_numbers = #tpu.dot_dimension_numbers<[1], [1], [0], [0], [0, 0, 1, 0], [], []>} : vector<8x8xbf16>, vector<8x8xbf16>, vector<8x8xf32> -> vector<8x8xf32>
    %cst_14 = arith.constant 0.353553385 : f32
    %31 = vector.broadcast %cst_14 : f32 to vector<8x8xf32>
    %32 = arith.mulf %30, %31 : vector<8x8xf32>
    %cst_15 = arith.constant dense<0xFF800000> : vector<8xf32>
    %33 = vector.multi_reduction <maximumf>, %32, %cst_15 [1] : vector<8x8xf32> to vector<8xf32>
    %34 = vector.shape_cast %33 : vector<8xf32> to vector<8x1xf32>
    %35 = vector.broadcast %34 : vector<8x1xf32> to vector<8x8xf32>
    %36 = arith.subf %32, %35 : vector<8x8xf32>
    %37 = math.exp %36 : vector<8x8xf32>
    %cst_16 = arith.constant dense<0.000000e+00> : vector<8xf32>
    %38 = vector.multi_reduction <add>, %37, %cst_16 [1] : vector<8x8xf32> to vector<8xf32>
    %39 = vector.shape_cast %38 : vector<8xf32> to vector<8x1xf32>
    %40 = vector.broadcast %39 : vector<8x1xf32> to vector<8x8xf32>
    %41 = arith.divf %37, %40 : vector<8x8xf32>
    %42 = arith.truncf %41 : vector<8x8xf32> to vector<8x8xbf16>
    %cst_17 = arith.constant dense<0.000000e+00> : vector<8x8xf32>
    %43 = tpu.matmul %42, %29, %cst_17 {dimension_numbers = #tpu.dot_dimension_numbers<[1], [0], [0], [1], [0, 0, 1, 1], [], []>} : vector<8x8xbf16>, vector<8x8xbf16>, vector<8x8xf32> -> vector<8x8xf32>
    %44 = arith.truncf %43 : vector<8x8xf32> to vector<8x8xbf16>
    %c0_18 = arith.constant 0 : index
    %c0_19 = arith.constant 0 : index
    %c0_20 = arith.constant 0 : index
    %c0_21 = arith.constant 0 : index
    %45 = vector.load %arg5[%c0_18, %c0_19, %c0_20, %c0_21] : memref<1x4x8x32xbf16, #tpu.memory_space<vmem>>, vector<1x1x8x32xbf16>
    %46 = vector.shape_cast %45 : vector<1x1x8x32xbf16> to vector<8x32xbf16>
    %cst_22 = arith.constant dense<0.000000e+00> : vector<8x32xf32>
    %47 = tpu.matmul %44, %46, %cst_22 {dimension_numbers = #tpu.dot_dimension_numbers<[1], [0], [0], [1], [0, 0, 1, 1], [], []>} : vector<8x8xbf16>, vector<8x32xbf16>, vector<8x32xf32> -> vector<8x32xf32>
    %48 = arith.addf %23, %47 : vector<8x32xf32>
    %49 = vector.extract_strided_slice %22 {offsets = [0, 8], sizes = [8, 8], strides = [1, 1]} : vector<8x96xf32> to vector<8x8xf32>
    %50 = arith.truncf %49 : vector<8x8xf32> to vector<8x8xbf16>
    %51 = vector.extract_strided_slice %22 {offsets = [0, 40], sizes = [8, 8], strides = [1, 1]} : vector<8x96xf32> to vector<8x8xf32>
    %52 = arith.truncf %51 : vector<8x8xf32> to vector<8x8xbf16>
    %53 = vector.extract_strided_slice %22 {offsets = [0, 72], sizes = [8, 8], strides = [1, 1]} : vector<8x96xf32> to vector<8x8xf32>
    %54 = arith.truncf %53 : vector<8x8xf32> to vector<8x8xbf16>
    %cst_23 = arith.constant dense<0.000000e+00> : vector<8x8xf32>
    %55 = tpu.matmul %50, %52, %cst_23 {dimension_numbers = #tpu.dot_dimension_numbers<[1], [1], [0], [0], [0, 0, 1, 0], [], []>} : vector<8x8xbf16>, vector<8x8xbf16>, vector<8x8xf32> -> vector<8x8xf32>
    %cst_24 = arith.constant 0.353553385 : f32
    %56 = vector.broadcast %cst_24 : f32 to vector<8x8xf32>
    %57 = arith.mulf %55, %56 : vector<8x8xf32>
    %cst_25 = arith.constant dense<0xFF800000> : vector<8xf32>
    %58 = vector.multi_reduction <maximumf>, %57, %cst_25 [1] : vector<8x8xf32> to vector<8xf32>
    %59 = vector.shape_cast %58 : vector<8xf32> to vector<8x1xf32>
    %60 = vector.broadcast %59 : vector<8x1xf32> to vector<8x8xf32>
    %61 = arith.subf %57, %60 : vector<8x8xf32>
    %62 = math.exp %61 : vector<8x8xf32>
    %cst_26 = arith.constant dense<0.000000e+00> : vector<8xf32>
    %63 = vector.multi_reduction <add>, %62, %cst_26 [1] : vector<8x8xf32> to vector<8xf32>
    %64 = vector.shape_cast %63 : vector<8xf32> to vector<8x1xf32>
    %65 = vector.broadcast %64 : vector<8x1xf32> to vector<8x8xf32>
    %66 = arith.divf %62, %65 : vector<8x8xf32>
    %67 = arith.truncf %66 : vector<8x8xf32> to vector<8x8xbf16>
    %cst_27 = arith.constant dense<0.000000e+00> : vector<8x8xf32>
    %68 = tpu.matmul %67, %54, %cst_27 {dimension_numbers = #tpu.dot_dimension_numbers<[1], [0], [0], [1], [0, 0, 1, 1], [], []>} : vector<8x8xbf16>, vector<8x8xbf16>, vector<8x8xf32> -> vector<8x8xf32>
    %69 = arith.truncf %68 : vector<8x8xf32> to vector<8x8xbf16>
    %c0_28 = arith.constant 0 : index
    %c1 = arith.constant 1 : index
    %c0_29 = arith.constant 0 : index
    %c0_30 = arith.constant 0 : index
    %70 = vector.load %arg5[%c0_28, %c1, %c0_29, %c0_30] : memref<1x4x8x32xbf16, #tpu.memory_space<vmem>>, vector<1x1x8x32xbf16>
    %71 = vector.shape_cast %70 : vector<1x1x8x32xbf16> to vector<8x32xbf16>
    %cst_31 = arith.constant dense<0.000000e+00> : vector<8x32xf32>
    %72 = tpu.matmul %69, %71, %cst_31 {dimension_numbers = #tpu.dot_dimension_numbers<[1], [0], [0], [1], [0, 0, 1, 1], [], []>} : vector<8x8xbf16>, vector<8x32xbf16>, vector<8x32xf32> -> vector<8x32xf32>
    %73 = arith.addf %48, %72 : vector<8x32xf32>
    %74 = vector.extract_strided_slice %22 {offsets = [0, 16], sizes = [8, 8], strides = [1, 1]} : vector<8x96xf32> to vector<8x8xf32>
    %75 = arith.truncf %74 : vector<8x8xf32> to vector<8x8xbf16>
    %76 = vector.extract_strided_slice %22 {offsets = [0, 48], sizes = [8, 8], strides = [1, 1]} : vector<8x96xf32> to vector<8x8xf32>
    %77 = arith.truncf %76 : vector<8x8xf32> to vector<8x8xbf16>
    %78 = vector.extract_strided_slice %22 {offsets = [0, 80], sizes = [8, 8], strides = [1, 1]} : vector<8x96xf32> to vector<8x8xf32>
    %79 = arith.truncf %78 : vector<8x8xf32> to vector<8x8xbf16>
    %cst_32 = arith.constant dense<0.000000e+00> : vector<8x8xf32>
    %80 = tpu.matmul %75, %77, %cst_32 {dimension_numbers = #tpu.dot_dimension_numbers<[1], [1], [0], [0], [0, 0, 1, 0], [], []>} : vector<8x8xbf16>, vector<8x8xbf16>, vector<8x8xf32> -> vector<8x8xf32>
    %cst_33 = arith.constant 0.353553385 : f32
    %81 = vector.broadcast %cst_33 : f32 to vector<8x8xf32>
    %82 = arith.mulf %80, %81 : vector<8x8xf32>
    %cst_34 = arith.constant dense<0xFF800000> : vector<8xf32>
    %83 = vector.multi_reduction <maximumf>, %82, %cst_34 [1] : vector<8x8xf32> to vector<8xf32>
    %84 = vector.shape_cast %83 : vector<8xf32> to vector<8x1xf32>
    %85 = vector.broadcast %84 : vector<8x1xf32> to vector<8x8xf32>
    %86 = arith.subf %82, %85 : vector<8x8xf32>
    %87 = math.exp %86 : vector<8x8xf32>
    %cst_35 = arith.constant dense<0.000000e+00> : vector<8xf32>
    %88 = vector.multi_reduction <add>, %87, %cst_35 [1] : vector<8x8xf32> to vector<8xf32>
    %89 = vector.shape_cast %88 : vector<8xf32> to vector<8x1xf32>
    %90 = vector.broadcast %89 : vector<8x1xf32> to vector<8x8xf32>
    %91 = arith.divf %87, %90 : vector<8x8xf32>
    %92 = arith.truncf %91 : vector<8x8xf32> to vector<8x8xbf16>
    %cst_36 = arith.constant dense<0.000000e+00> : vector<8x8xf32>
    %93 = tpu.matmul %92, %79, %cst_36 {dimension_numbers = #tpu.dot_dimension_numbers<[1], [0], [0], [1], [0, 0, 1, 1], [], []>} : vector<8x8xbf16>, vector<8x8xbf16>, vector<8x8xf32> -> vector<8x8xf32>
    %94 = arith.truncf %93 : vector<8x8xf32> to vector<8x8xbf16>
    %c0_37 = arith.constant 0 : index
    %c2 = arith.constant 2 : index
    %c0_38 = arith.constant 0 : index
    %c0_39 = arith.constant 0 : index
    %95 = vector.load %arg5[%c0_37, %c2, %c0_38, %c0_39] : memref<1x4x8x32xbf16, #tpu.memory_space<vmem>>, vector<1x1x8x32xbf16>
    %96 = vector.shape_cast %95 : vector<1x1x8x32xbf16> to vector<8x32xbf16>
    %cst_40 = arith.constant dense<0.000000e+00> : vector<8x32xf32>
    %97 = tpu.matmul %94, %96, %cst_40 {dimension_numbers = #tpu.dot_dimension_numbers<[1], [0], [0], [1], [0, 0, 1, 1], [], []>} : vector<8x8xbf16>, vector<8x32xbf16>, vector<8x32xf32> -> vector<8x32xf32>
    %98 = arith.addf %73, %97 : vector<8x32xf32>
    %99 = vector.extract_strided_slice %22 {offsets = [0, 24], sizes = [8, 8], strides = [1, 1]} : vector<8x96xf32> to vector<8x8xf32>
    %100 = arith.truncf %99 : vector<8x8xf32> to vector<8x8xbf16>
    %101 = vector.extract_strided_slice %22 {offsets = [0, 56], sizes = [8, 8], strides = [1, 1]} : vector<8x96xf32> to vector<8x8xf32>
    %102 = arith.truncf %101 : vector<8x8xf32> to vector<8x8xbf16>
    %103 = vector.extract_strided_slice %22 {offsets = [0, 88], sizes = [8, 8], strides = [1, 1]} : vector<8x96xf32> to vector<8x8xf32>
    %104 = arith.truncf %103 : vector<8x8xf32> to vector<8x8xbf16>
    %cst_41 = arith.constant dense<0.000000e+00> : vector<8x8xf32>
    %105 = tpu.matmul %100, %102, %cst_41 {dimension_numbers = #tpu.dot_dimension_numbers<[1], [1], [0], [0], [0, 0, 1, 0], [], []>} : vector<8x8xbf16>, vector<8x8xbf16>, vector<8x8xf32> -> vector<8x8xf32>
    %cst_42 = arith.constant 0.353553385 : f32
    %106 = vector.broadcast %cst_42 : f32 to vector<8x8xf32>
    %107 = arith.mulf %105, %106 : vector<8x8xf32>
    %cst_43 = arith.constant dense<0xFF800000> : vector<8xf32>
    %108 = vector.multi_reduction <maximumf>, %107, %cst_43 [1] : vector<8x8xf32> to vector<8xf32>
    %109 = vector.shape_cast %108 : vector<8xf32> to vector<8x1xf32>
    %110 = vector.broadcast %109 : vector<8x1xf32> to vector<8x8xf32>
    %111 = arith.subf %107, %110 : vector<8x8xf32>
    %112 = math.exp %111 : vector<8x8xf32>
    %cst_44 = arith.constant dense<0.000000e+00> : vector<8xf32>
    %113 = vector.multi_reduction <add>, %112, %cst_44 [1] : vector<8x8xf32> to vector<8xf32>
    %114 = vector.shape_cast %113 : vector<8xf32> to vector<8x1xf32>
    %115 = vector.broadcast %114 : vector<8x1xf32> to vector<8x8xf32>
    %116 = arith.divf %112, %115 : vector<8x8xf32>
    %117 = arith.truncf %116 : vector<8x8xf32> to vector<8x8xbf16>
    %cst_45 = arith.constant dense<0.000000e+00> : vector<8x8xf32>
    %118 = tpu.matmul %117, %104, %cst_45 {dimension_numbers = #tpu.dot_dimension_numbers<[1], [0], [0], [1], [0, 0, 1, 1], [], []>} : vector<8x8xbf16>, vector<8x8xbf16>, vector<8x8xf32> -> vector<8x8xf32>
    %119 = arith.truncf %118 : vector<8x8xf32> to vector<8x8xbf16>
    %c0_46 = arith.constant 0 : index
    %c3 = arith.constant 3 : index
    %c0_47 = arith.constant 0 : index
    %c0_48 = arith.constant 0 : index
    %120 = vector.load %arg5[%c0_46, %c3, %c0_47, %c0_48] : memref<1x4x8x32xbf16, #tpu.memory_space<vmem>>, vector<1x1x8x32xbf16>
    %121 = vector.shape_cast %120 : vector<1x1x8x32xbf16> to vector<8x32xbf16>
    %cst_49 = arith.constant dense<0.000000e+00> : vector<8x32xf32>
    %122 = tpu.matmul %119, %121, %cst_49 {dimension_numbers = #tpu.dot_dimension_numbers<[1], [0], [0], [1], [0, 0, 1, 1], [], []>} : vector<8x8xbf16>, vector<8x32xbf16>, vector<8x32xf32> -> vector<8x32xf32>
    %123 = arith.addf %98, %122 : vector<8x32xf32>
    %124 = arith.addf %4, %123 : vector<8x32xf32>
    %c0_50 = arith.constant 0 : index
    %c0_51 = arith.constant 0 : index
    %c0_52 = arith.constant 0 : index
    %125 = vector.load %arg6[%c0_50, %c0_51, %c0_52] : memref<1x1x32xf32, #tpu.memory_space<vmem>>, vector<1x1x32xf32>
    %126 = vector.shape_cast %125 : vector<1x1x32xf32> to vector<1x32xf32>
    %127 = arith.mulf %124, %124 : vector<8x32xf32>
    %cst_53 = arith.constant dense<0.000000e+00> : vector<8xf32>
    %128 = vector.multi_reduction <add>, %127, %cst_53 [1] : vector<8x32xf32> to vector<8xf32>
    %129 = vector.shape_cast %128 : vector<8xf32> to vector<8x1xf32>
    %cst_54 = arith.constant 3.200000e+01 : f32
    %130 = vector.broadcast %cst_54 : f32 to vector<8x1xf32>
    %131 = arith.divf %129, %130 : vector<8x1xf32>
    %132 = math.sqrt %131 : vector<8x1xf32>
    %cst_55 = arith.constant 9.99999974E-6 : f32
    %133 = vector.broadcast %cst_55 : f32 to vector<8x1xf32>
    %134 = arith.addf %132, %133 : vector<8x1xf32>
    %135 = vector.broadcast %134 : vector<8x1xf32> to vector<8x32xf32>
    %136 = arith.divf %124, %135 : vector<8x32xf32>
    %137 = vector.broadcast %126 : vector<1x32xf32> to vector<8x32xf32>
    %138 = arith.mulf %136, %137 : vector<8x32xf32>
    %139 = arith.truncf %138 : vector<8x32xf32> to vector<8x32xbf16>
    %c0_56 = arith.constant 0 : index
    %c0_57 = arith.constant 0 : index
    %c0_58 = arith.constant 0 : index
    %140 = vector.load %arg7[%c0_56, %c0_57, %c0_58] : memref<1x32x128xbf16, #tpu.memory_space<vmem>>, vector<1x32x128xbf16>
    %141 = vector.shape_cast %140 : vector<1x32x128xbf16> to vector<32x128xbf16>
    %cst_59 = arith.constant dense<0.000000e+00> : vector<8x128xf32>
    %142 = tpu.matmul %139, %141, %cst_59 {dimension_numbers = #tpu.dot_dimension_numbers<[1], [0], [0], [1], [0, 0, 1, 1], [], []>} : vector<8x32xbf16>, vector<32x128xbf16>, vector<8x128xf32> -> vector<8x128xf32>
    %143 = vector.extract_strided_slice %142 {offsets = [0, 0], sizes = [8, 64], strides = [1, 1]} : vector<8x128xf32> to vector<8x64xf32>
    %144 = vector.extract_strided_slice %142 {offsets = [0, 64], sizes = [8, 64], strides = [1, 1]} : vector<8x128xf32> to vector<8x64xf32>
    %145 = arith.mulf %143, %144 : vector<8x64xf32>
    %146 = arith.negf %145 : vector<8x64xf32>
    %147 = math.exp %146 : vector<8x64xf32>
    %cst_60 = arith.constant 1.000000e+00 : f32
    %148 = vector.broadcast %cst_60 : f32 to vector<8x64xf32>
    %149 = arith.addf %148, %147 : vector<8x64xf32>
    %150 = arith.divf %148, %149 : vector<8x64xf32>
    %151 = arith.mulf %145, %150 : vector<8x64xf32>
    %152 = arith.truncf %151 : vector<8x64xf32> to vector<8x64xbf16>
    %c0_61 = arith.constant 0 : index
    %c0_62 = arith.constant 0 : index
    %c0_63 = arith.constant 0 : index
    %153 = vector.load %arg8[%c0_61, %c0_62, %c0_63] : memref<1x64x32xbf16, #tpu.memory_space<vmem>>, vector<1x64x32xbf16>
    %154 = vector.shape_cast %153 : vector<1x64x32xbf16> to vector<64x32xbf16>
    %cst_64 = arith.constant dense<0.000000e+00> : vector<8x32xf32>
    %155 = tpu.matmul %152, %154, %cst_64 {dimension_numbers = #tpu.dot_dimension_numbers<[1], [0], [0], [1], [0, 0, 1, 1], [], []>} : vector<8x64xbf16>, vector<64x32xbf16>, vector<8x32xf32> -> vector<8x32xf32>
    %156 = arith.addf %124, %155 : vector<8x32xf32>
    %c0_65 = arith.constant 0 : index
    %c0_66 = arith.constant 0 : index
    %c0_67 = arith.constant 0 : index
    %157 = vector.load %arg10[%c0_65, %c0_66, %c0_67] : memref<1x8x32xf32, #tpu.memory_space<vmem>>, vector<1x8x32xf32>
    %158 = vector.shape_cast %157 : vector<1x8x32xf32> to vector<8x32xf32>
    %159 = vector.shape_cast %156 : vector<8x32xf32> to vector<1x8x32xf32>
    tpu.vector_store %arg10[%c0_65, %c0_66, %c0_67], %159 {strides = array<i32>} : memref<1x8x32xf32, #tpu.memory_space<vmem>>, vector<1x8x32xf32>,
    %c1_i32 = arith.constant 1 : i32
    %160 = arith.cmpi eq, %arg1, %c1_i32 : i32
    %161 = arith.extui %160 : i1 to i32
    %c0_i32_68 = arith.constant 0 : i32
    %162 = arith.cmpi ne, %161, %c0_i32_68 : i32
    scf.if %162 {
      %c0_69 = arith.constant 0 : index
      %c0_70 = arith.constant 0 : index
      %163 = vector.load %arg9[%c0_69, %c0_70] : memref<1x32xf32, #tpu.memory_space<vmem>>, vector<1x32xf32>
      %164 = arith.mulf %156, %156 : vector<8x32xf32>
      %cst_71 = arith.constant dense<0.000000e+00> : vector<8xf32>
      %165 = vector.multi_reduction <add>, %164, %cst_71 [1] : vector<8x32xf32> to vector<8xf32>
      %166 = vector.shape_cast %165 : vector<8xf32> to vector<8x1xf32>
      %cst_72 = arith.constant 3.200000e+01 : f32
      %167 = vector.broadcast %cst_72 : f32 to vector<8x1xf32>
      %168 = arith.divf %166, %167 : vector<8x1xf32>
      %169 = math.sqrt %168 : vector<8x1xf32>
      %cst_73 = arith.constant 9.99999974E-6 : f32
      %170 = vector.broadcast %cst_73 : f32 to vector<8x1xf32>
      %171 = arith.addf %169, %170 : vector<8x1xf32>
      %172 = vector.broadcast %171 : vector<8x1xf32> to vector<8x32xf32>
      %173 = arith.divf %156, %172 : vector<8x32xf32>
      %174 = vector.broadcast %163 : vector<1x32xf32> to vector<8x32xf32>
      %175 = arith.mulf %173, %174 : vector<8x32xf32>
      %c0_74 = arith.constant 0 : index
      %c0_75 = arith.constant 0 : index
      %c0_76 = arith.constant 0 : index
      %176 = vector.load %arg10[%c0_74, %c0_75, %c0_76] : memref<1x8x32xf32, #tpu.memory_space<vmem>>, vector<1x8x32xf32>
      %177 = vector.shape_cast %176 : vector<1x8x32xf32> to vector<8x32xf32>
      %178 = vector.shape_cast %175 : vector<8x32xf32> to vector<1x8x32xf32>
      tpu.vector_store %arg10[%c0_74, %c0_75, %c0_76], %178 {strides = array<i32>} : memref<1x8x32xf32, #tpu.memory_space<vmem>>, vector<1x8x32xf32>,
    } else {
    }
    return
  }
  func.func @transform_0(%arg0: i32, %arg1: i32) -> (i32, i32, i32) {
    %c0_i32 = arith.constant 0 : i32
    %c0_i32_0 = arith.constant 0 : i32
    %c0_i32_1 = arith.constant 0 : i32
    return %arg0, %c0_i32, %c0_i32_0 : i32, i32, i32
  }
  func.func @transform_1(%arg0: i32, %arg1: i32) -> (i32, i32, i32) {
    %c0_i32 = arith.constant 0 : i32
    %c0_i32_0 = arith.constant 0 : i32
    %c0_i32_1 = arith.constant 0 : i32
    return %arg1, %c0_i32, %c0_i32_0 : i32, i32, i32
  }
  func.func @transform_2(%arg0: i32, %arg1: i32) -> (i32, i32, i32) {
    %c0_i32 = arith.constant 0 : i32
    %c0_i32_0 = arith.constant 0 : i32
    %c0_i32_1 = arith.constant 0 : i32
    return %arg1, %c0_i32, %c0_i32_0 : i32, i32, i32
  }
  func.func @transform_3(%arg0: i32, %arg1: i32) -> (i32, i32, i32, i32) {
    %c0_i32 = arith.constant 0 : i32
    %c0_i32_0 = arith.constant 0 : i32
    %c0_i32_1 = arith.constant 0 : i32
    %c0_i32_2 = arith.constant 0 : i32
    return %arg1, %c0_i32, %c0_i32_0, %c0_i32_1 : i32, i32, i32, i32
  }
  func.func @transform_4(%arg0: i32, %arg1: i32) -> (i32, i32, i32) {
    %c0_i32 = arith.constant 0 : i32
    %c0_i32_0 = arith.constant 0 : i32
    %c0_i32_1 = arith.constant 0 : i32
    return %arg1, %c0_i32, %c0_i32_0 : i32, i32, i32
  }
  func.func @transform_5(%arg0: i32, %arg1: i32) -> (i32, i32, i32) {
    %c0_i32 = arith.constant 0 : i32
    %c0_i32_0 = arith.constant 0 : i32
    %c0_i32_1 = arith.constant 0 : i32
    return %arg1, %c0_i32, %c0_i32_0 : i32, i32, i32
  }
  func.func @transform_6(%arg0: i32, %arg1: i32) -> (i32, i32, i32) {
    %c0_i32 = arith.constant 0 : i32
    %c0_i32_0 = arith.constant 0 : i32
    %c0_i32_1 = arith.constant 0 : i32
    return %arg1, %c0_i32, %c0_i32_0 : i32, i32, i32
  }
  func.func @transform_7(%arg0: i32, %arg1: i32) -> (i32, i32) {
    %c0_i32 = arith.constant 0 : i32
    %c0_i32_0 = arith.constant 0 : i32
    %c0_i32_1 = arith.constant 0 : i32
    return %c0_i32, %c0_i32_0 : i32, i32
  }
  func.func @transform_8(%arg0: i32, %arg1: i32) -> (i32, i32, i32) {
    %c0_i32 = arith.constant 0 : i32
    %c0_i32_0 = arith.constant 0 : i32
    %c0_i32_1 = arith.constant 0 : i32
    return %arg0, %c0_i32, %c0_i32_0 : i32, i32, i32
  }
}

</mosaic_0001>

<bundles_post_ra>
// kernel: llama_forward.1
= control target key start
LH: loop header
LB: loop body
LE: loop exit
PB: predicated region body
PF: predicated region fallthrough
CT: control target
= control target key end

     0   :  { %s2279_s0 = inlined_call_operand.vmem [shape: f32[2,8,32], index: 0, kind: input, shape index: {}]   ;;  %s2280_s1 = inlined_call_operand.vmem [shape: f32[2,1,32], index: 1, kind: input, shape index: {}]   ;;  %s2281_s2 = inlined_call_operand.vmem [shape: bf16[2,32,96], index: 2, kind: input, shape index: {}]   ;;  %s2282_s3 = inlined_call_operand.vmem [shape: bf16[2,4,8,32], index: 3, kind: input, shape index: {}]   ;;  %s2283_s4 = inlined_call_operand.vmem [shape: f32[2,1,32], index: 4, kind: input, shape index: {}]   ;;  %s2284_s5 = inlined_call_operand.vmem [shape: bf16[2,32,128], index: 5, kind: input, shape index: {}]   ;;  %s2285_s6 = inlined_call_operand.vmem [shape: bf16[2,64,32], index: 6, kind: input, shape index: {}]   ;;  %s2286_s7 = inlined_call_operand.vmem [shape: f32[1,32], index: 7, kind: input, shape index: {}]   ;;  %s2287_s8 = inlined_call_operand.hbm [shape: f32[2,8,32], index: 8, kind: output, shape index: {}]  }
   0x1   :  { %2298 = sst [smem:[#allocation14_spill]] %s2287_s8 }
   0x2   :  { %13 = vsyncpa [#allocation3], 0 }
   0x3   :  { %15 = vsyncpa [#allocation3 + $0x1], 0  ;;  %s1978_s27 = smov 0   ;;  %s1980_s28 = smov 0  }
   0x4   :  { %s1982_s29 = smov 0   ;;  %s1984_s30 = smov 0  }
   0x5   :  { %s1986_s9 = smov 0   ;;  %s1988_s10 = smov 0  }
   0x6   :  { %s1990_s11 = smov 0   ;;  %s1992_s12 = smov 0  }
   0x7 LB: > { %2299 = sst [smem:[#allocation5_spill]] %s1889_s27  ;;  %s1511_s13 = sadd.s32 4294967295, %s1917_s12   ;;  %s1917_s12 = sphi %s1992_s12, %s21_s12   ;;  %s1913_s11 = sphi %s1990_s11, %s2322_s11   ;;  %s1909_s10 = sphi %s1988_s10, %s2321_s10   ;;  %s1905_s9 = sphi %s1986_s9, %s2320_s9   ;;  %s1901_s30 = sphi %s1984_s30, %s2319_s30   ;;  %s1897_s29 = sphi %s1982_s29, %s2325_s29   ;;  %s1893_s28 = sphi %s1980_s28, %s2324_s28   ;;  %s1889_s27 = sphi %s1978_s27, %s2323_s27  }
   0x8   : > { %2300 = sst [smem:[#allocation6_spill]] %s1897_s29  ;;  %s1512_s14 = sadd.s32 4294967294, %s1917_s12  }
   0x9   : > { %2301 = sst [smem:[#allocation7_spill]] %s1909_s10  ;;  %s30_s15 = sadd.s32 1, %s1909_s10 }
   0xa   : > { %2302 = sst [smem:[#allocation8_spill]] %s1913_s11  ;;  %p31_p0 = scmp.ge.s32.totalorder %s30_s15, 2 }
   0xb   : > { %2303 = sst [smem:[#allocation9_spill]] %s1917_s12  ;;  %s33_s16 = sadd.s32 1, %s1913_s11 }
   0xc   : > { %p253_p1 = scmp.ne.s32.totalorder %s1897_s29, %s1893_s28  ;;  %p254_p2 = scmp.eq.s32.totalorder %s1511_s13, 3 }
   0xd   : > { %s2327_s15 = smov (%p31_p0, %s30_s15), 0  ;;  %s2329_s16 = smov (!%p31_p0, %s33_s16), %s1913_s11 }
   0xe   : > { %2304 = sst [smem:[#allocation10_spill]] %s2327_s15  ;;  %p2027_p3 = por %p254_p2, %p253_p1 }
   0xf   : > { %p259_p4 = scmp.ne.s32.totalorder %s1893_s28, %s1889_s27  ;;  %p35_p5 = scmp.ge.s32.totalorder %s2329_s16, 2 }
  0x10   : > { %p260_p6 = scmp.eq.s32.totalorder %s1512_s14, 3  ;;  %p1515_p7 = scmp.ge.s32.totalorder %s1917_s12, 1 }
  0x11   : > { %p332_p8 = scmp.lt.s32.totalorder %s1917_s12, 5  ;;  %s2331_s16 = smov (%p35_p5, %s2329_s16), 0 }
  0x12   : > { %2306 = sst [smem:[#allocation11_spill]] %s2331_s16  ;;  %p2037_p9 = por %p260_p6, %p259_p4 }
  0x13   : > { %p333_p10 = pnand %p1515_p7, %p332_p8  ;;  %s240_s19 = ssub.s32 %s1913_s11, %s2331_s16 }
  0x14   : > { %s2307_s18 = scalar_select %p2037_p9, 1, 0 }
  0x15   : > { %s243_s20 = sadd.s32 1, %s1897_s29  ;;  %p241_p11 = scmp.eq.s32.totalorder %s240_s19, 0 }
  0x16   : > { %2308 = sst [smem:[#allocation12_spill]] %s2307_s18  ;;  %336 = sbr.rel (%p333_p10) target bundleno = 3622 (0xe26), region = 52 }
  0x17   : > { %s2045_s21 = scalar_select %p241_p11, %s1897_s29, %s243_s20  }
  0x18   : > { %s2291_s22 = sand.u32 (!%p333_p10), 1, %s1893_s28   ;;  %p391_p12 = scmp.lt.s32.totalorder (!%p333_p10), %s1905_s9, 1 }
  0x19   : > { %2309 = sst [smem:[#allocation13_spill]] %s2045_s21  ;;  %s1516_s23 = sshll.u32 (!%p333_p10), %s2291_s22, 3 }
  0x1a   : > { %p395_p13 = scmp.lt.s32.totalorder (!%p333_p10), %s1901_s30, 1  ;;  %s2087_s22 = scalar_lea.vmem (!%p333_p10), [#allocation2], %s1516_s23 }
  0x1b   : > { %s392_s24 = scalar_select %p391_p12, %s1905_s9, 1 }
  0x1c   : > { %s2054_s25 = scalar_select %p395_p13, %s1901_s30, 1 }
  0x1d   : > { %s1517_s26 = sshll.u32 %s392_s24, 3  ;;  %p1526_p0 = scmp.ne.s32.totalorder %s1901_s30, 0 }
  0x1e   : > { %s394_s19 = scalar_lea.vmem %s2279_s0, %s1517_s26  ;;  %s1562_s11 = sshll.u32 %s2054_s25, 4 }
  0x1f   : > { %s410_s21 = scalar_lea.vmem %s2283_s4, %s2054_s25  ;;  %s402_s27 = scalar_lea.vmem %s2281_s2, %s1562_s11 }
  0x20   : > { %s2074_s24 = scalar_lea.vmem %s2282_s3, %s1562_s11  ;;  %s2079_s14 = scalar_lea.vmem %s2284_s5, %s1562_s11 }
  0x21   : > { %s1565_s16 = sshll.u32 %s2054_s25, 5  ;;  %425 = sbr.rel (%p1526_p0) target bundleno = 40 (0x28), region = 56 }
  0x22   : > { %s2085_s10 = scalar_lea.vmem %s2285_s6, %s1565_s16 }
  0x26   : > { %v426_v0 = vld [vmem:[%s394_s19] sm:$0xff]  ;;  %vm427_vm0 = vcmask 261120  }
  0x27   : > { %428 = vst.msk [vmem:[%s2087_s22] sm:$0xff] %vm427_vm0, %v426_v0 }
  0x28 PF: > { %vm432_vm1 = vcmask 261120   ;;  %v1785_v4 = vld [vmem:[%s402_s27 + $0x8] sm:$0xff]   ;;  %v1919_v5 = vmov 0.0   ;;  %vm1920_vm2 = vmmov 0   ;;  %v1786_v6 = vld [vmem:[%s402_s27] sm:$0xff]   ;;  %s2310_s29 = scalar_lea.vmem %s2280_s1, %s2054_s25  ;;  %s1921_s11 = smov 88  }
  0x29   : > { %1601 = vmatprep.subr.bf16.mxu1 %v1919_v5  ;;  %1605 = vmatprep.mubr.msk.bf16.mxu1 %vm1920_vm2, %v1919_v5  ;;  %v1527_v16 = vld [vmem:[%s2310_s29] ss:$0 sm:$0xff]  ;;  %s1922_s12 = smov 96   ;;  %s1923_s15 = smov 120   ;;  %vm519_vm5 = vcmask 64512   ;;  %vm584_vm6 = vcmask 1043456  }
  0x2a   : > { %1602 = vmatpush3.bf16.msra.mxu1 %v1785_v4  ;;  %1615 = vmatprep.subr.bf16.mxu0 %v1919_v5  ;;  %s1924_s18 = smov 56   ;;  %s1925_s23 = smov 64   ;;  %v629_v0 = vld [vmem:[%s2074_s24] sm:$0xf]  ;;  %vm1287_vm9 = vcmask 523264  }
  0x2b   : > { %1603 = vmatprep.subr.bf16.mxu1 %v1919_v5  ;;  %1617 = vmatprep.mubr.msk.bf16.mxu0 %vm1920_vm2, %v1919_v5  ;;  %s1926_s19 = smov 80   ;;  %s1927_s13 = smov 112  }
  0x2c   : > { %s1928_s26 = smov 72   ;;  %s1929_s16 = smov 104  }
  0x2d   : > { %s1930_s20 = smov 48   ;;  %s1931_s8 = smov 40  }
  0x2e   : > { %v2092_v1 = vld [vmem:[%s2087_s22] sm:$0xff]  ;;  %1604 = vmatpush3.bf16.msra.mxu1 %v1786_v6  ;;  %p1556_p1 = scmp.ne.s32.totalorder %s1901_s30, 1 }
  0x2f   : > { %v431_v2 = vmul.f32 %v2092_v1, %v2092_v1  ;;  %1609 = vmatprep.subr.bf16.mxu1 %v1919_v5 }
  0x31   : > { %v433_v3 = vsel %vm432_vm1, %v431_v2, 0.0  ;;  %v794_v2 = vsel %vm584_vm6, %v629_v0, 0 }
  0x32   : > { %434 = vadd.xlane.f32.xlu0 %v433_v3  ;;  %v1535_v3 = vld [vmem:[%s2074_s24 + $0x4] sm:$0xf] }
  0x33   : > { %v748_v4 = vsel %vm584_vm6, %v1535_v3, 0 }
  0xbb   : > { %v435_v7 = vpop.xlane.xlu0 %434 }
  0xbc   : > { %v437_v8 = vmul.f32 0.03125, %v435_v7 }
  0xbe   : > { %1793 = vrsqrt.f32 %v437_v8  ;;  %vm440_vm3 = vcmp.eq.f32.partialorder %v437_v8, inf  ;;  %v443_v11 = vand.u32 2147483648, %v437_v8  ;;  %vm442_vm4 = vcmp.eq.f32.partialorder %v437_v8, 0.0 }
  0xcb   : > { %v1794_v9 = vpop.eup %1793 }
  0xcc   : > { %v439_v10 = vmul.f32 %v1794_v9, %v437_v8 }
  0xce   : > { %v441_v12 = vsel %vm440_vm3, %v437_v8, %v439_v10 }
  0xcf   : > { %v444_v13 = vsel %vm442_vm4, %v443_v11, %v441_v12 }
  0xd0   : > { %v445_v14 = vadd.f32 1e-05, %v444_v13 }
  0xd2   : > { %1795 = vrcp.f32 %v445_v14 }
  0xdf   : > { %v1796_v15 = vpop.eup %1795 }
  0xe0   : > { %v447_v17 = vmul.f32 %v1796_v15, %v2092_v1 }
  0xe2   : > { %v454_v18 = vmul.f32 %v1527_v16, %v447_v17 }
  0xe4   : > { %v455_v19 = vpack.c.bf16 %v454_v18, %v454_v18 }
  0xe6   : > { %1606 = vmatmul.mubr.msk.bf16.vlgmr.msra.gmra.mxu1 %vm432_vm1, %v455_v19 }
  0xe7   : > { %1611 = vmatprep.mubr.msk.bf16.mxu1 %vm1920_vm2, %v1919_v5 }
 0x1a6   : > { %v509_v20 = vpop.f32.mrf.mxu1 }
 0x1a7   : > { %v2114_v21 = vpack.c.bf16 %v509_v20, %v509_v20 }
 0x1a8   : > { %v1607_v22 = vpop.f32.mrf.mxu1 }
 0x1a9   : > { %632 = vrot.lane.b32.xlu1 %v2114_v21, %s1921_s11  ;;  %517 = vrot.lane.b32.xlu0 %v2114_v21, %s1922_s12 }
 0x1aa   : > { %v512_v23 = vpop.f32.mrf.mxu1 }
 0x1ac   : > { %v1608_v24 = vpop.f32.mrf.mxu1 }
 0x1ad   : > { %630 = vrot.lane.b32.xlu1 %v2114_v21, %s1923_s15 }
 0x21b   : > { %v518_v25 = vpop.permute.xlu0 %517  ;;  %v633_v27 = vpop.permute.xlu1 %632 }
 0x21c   : > { %v524_v26 = vsel %vm519_vm5, %v518_v25, 0  ;;  %v638_v28 = vsel %vm519_vm5, %v633_v27, 0 }
 0x21d   : > { %1610 = vmatpush3.bf16.xpose.msra.mxu1 %v524_v26 }
 0x21e   : > { %1621 = vmatprep.subr.bf16.mxu1 %v1919_v5 }
 0x21f   : > { %v631_v29 = vpop.permute.xlu1 %630 }
 0x224   : > { %1612 = vmatmul.mubr.msk.bf16.vlgmr.msra.gmra.mxu1 %vm519_vm5, %v2114_v21 }
 0x225   : > { %1622 = vmatpush3.bf16.xpose.msra.mxu1 %v638_v28  ;;  %1623 = vmatprep.mubr.msk.bf16.mxu1 %vm1920_vm2, %v1919_v5 }
 0x226   : > { %1633 = vmatprep.subr.bf16.mxu1 %v1919_v5 }
 0x22c   : > { %1624 = vmatmul.mubr.msk.bf16.vlgmr.msra.gmra.mxu1 %vm519_vm5, %v631_v29 }
 0x22d   : > { %1635 = vmatprep.mubr.msk.bf16.mxu1 %vm1920_vm2, %v1919_v5  ;;  %1634 = vmatpush3.bf16.msra.mxu1 %v748_v4 }
 0x22e   : > { %1645 = vmatprep.subr.bf16.mxu1 %v1919_v5 }
 0x2e4   : > { %v560_v30 = vpop.f32.mrf.mxu1 }
 0x2e5   : > { %v566_v31 = vmul.f32 0.35355338, %v560_v30 }
 0x2e6   : > { %v1613_v32 = vpop.f32.mrf.mxu1 }
 0x2e7   : > { %v567_v33 = vsel %vm519_vm5, %v566_v31, -inf }
 0x2e8   : > { %568 = vmax.xlane.f32.xlu1 %v567_v33  ;;  %v563_v34 = vpop.f32.mrf.mxu1 }
 0x2ea   : > { %v1614_v35 = vpop.f32.mrf.mxu1 }
 0x2ec   : > { %v674_v36 = vpop.f32.mrf.mxu1 }
 0x2ed   : > { %v680_v37 = vmul.f32 0.35355338, %v674_v36 }
 0x2ee   : > { %v1625_v38 = vpop.f32.mrf.mxu1 }
 0x2ef   : > { %v681_v39 = vsel %vm519_vm5, %v680_v37, -inf }
 0x2f0   : > { %682 = vmax.xlane.f32.xlu0 %v681_v39  ;;  %v677_v40 = vpop.f32.mrf.mxu1 }
 0x2f2   : > { %v1626_v41 = vpop.f32.mrf.mxu1 }
 0x306   : > { %693 = vrot.lane.b32.xlu0 %v2114_v21, %s1924_s18 }
 0x371   : > { %v569_v42 = vpop.xlane.xlu1 %568 }
 0x372   : > { %v570_v43 = vsub.f32 %v566_v31, %v569_v42 }
 0x374   : > { %v571_v44 = vmul.f32 1.442695, %v570_v43 }
 0x376   : > { %1797 = vpow2.f32 %v571_v44 }
 0x379   : > { %v683_v45 = vpop.xlane.xlu0 %682 }
 0x37a   : > { %v684_v46 = vsub.f32 %v680_v37, %v683_v45 }
 0x37c   : > { %v685_v47 = vmul.f32 1.442695, %v684_v46 }
 0x37d   : > { %v694_v58 = vpop.permute.xlu0 %693 }
 0x37e   : > { %1799 = vpow2.f32 %v685_v47  ;;  %v699_v60 = vsel %vm584_vm6, %v694_v58, 0 }
 0x383   : > { %v1798_v48 = vpop.eup %1797 }
 0x384   : > { %v573_v49 = vsel %vm519_vm5, %v1798_v48, 0.0 }
 0x385   : > { %574 = vadd.xlane.f32.xlu1 %v573_v49  ;;  %v1540_v49 = vld [vmem:[%s2074_s24 + $0x8] sm:$0xf] }
 0x38b   : > { %v1800_v50 = vpop.eup %1799 }
 0x38c   : > { %v687_v51 = vsel %vm519_vm5, %v1800_v50, 0.0 }
 0x38d   : > { %688 = vadd.xlane.f32.xlu1 %v687_v51 }
 0x39e   : > { %579 = vrot.lane.b32.xlu1 %v2114_v21, %s1925_s23 }
 0x3a2   : > { %838 = vrot.lane.b32.xlu1 %v2114_v21, %s1926_s19 }
 0x3a6   : > { %836 = vrot.lane.b32.xlu1 %v2114_v21, %s1927_s13 }
 0x40e   : > { %v575_v52 = vpop.xlane.xlu1 %574 }
 0x40f   : > { %1801 = vrcp.f32 %v575_v52 }
 0x416   : > { %v689_v53 = vpop.xlane.xlu1 %688 }
 0x417   : > { %1803 = vrcp.f32 %v689_v53 }
 0x41a   : > { %v580_v54 = vpop.permute.xlu1 %579 }
 0x41b   : > { %v586_v55 = vsel %vm584_vm6, %v580_v54, 0 }
 0x41c   : > { %v1802_v56 = vpop.eup %1801  ;;  %1616 = vmatpush3.bf16.msra.mxu0 %v586_v55 }
 0x41d   : > { %1627 = vmatprep.subr.bf16.mxu0 %v1919_v5  ;;  %v577_v57 = vmul.f32 %v1802_v56, %v1798_v48 }
 0x41e   : > { %v839_v11 = vpop.permute.xlu1 %838 }
 0x41f   : > { %v578_v59 = vpack.c.bf16 %v577_v57, %v577_v57  ;;  %v844_v15 = vsel %vm519_vm5, %v839_v11, 0 }
 0x421   : > { %1618 = vmatmul.mubr.msk.bf16.vlgmr.msra.gmra.mxu0 %vm519_vm5, %v578_v59 }
 0x422   : > { %1628 = vmatpush3.bf16.msra.mxu0 %v699_v60  ;;  %1629 = vmatprep.mubr.msk.bf16.mxu0 %vm1920_vm2, %v1919_v5  ;;  %v837_v18 = vpop.permute.xlu1 %836 }
 0x423   : > { %1639 = vmatprep.subr.bf16.mxu0 %v1919_v5 }
 0x424   : > { %v1804_v61 = vpop.eup %1803 }
 0x425   : > { %v691_v62 = vmul.f32 %v1804_v61, %v1800_v50  ;;  %v954_v50 = vsel %vm584_vm6, %v1540_v49, 0  ;;  %v1789_v49 = vld [vmem:[%s2085_s10 + $0x18] sm:$0xff]  }
 0x427   : > { %v692_v63 = vpack.c.bf16 %v691_v62, %v691_v62 }
 0x429   : > { %1630 = vmatmul.mubr.msk.bf16.vlgmr.msra.gmra.mxu0 %vm519_vm5, %v692_v63 }
 0x42a   : > { %1641 = vmatprep.mubr.msk.bf16.mxu0 %vm1920_vm2, %v1919_v5  ;;  %1640 = vmatpush3.bf16.msra.mxu0 %v794_v2 }
 0x42b   : > { %1651 = vmatprep.subr.bf16.mxu0 %v1919_v5 }
 0x4e1   : > { %v622_v6 = vpop.f32.mrf.mxu0 }
 0x4e2   : > { %v628_v7 = vpack.c.bf16 %v622_v6, %v622_v6 }
 0x4e3   : > { %v1619_v8 = vpop.f32.mrf.mxu0 }
 0x4e4   : > { %1642 = vmatmul.mubr.msk.bf16.vlgmr.msra.gmra.mxu0 %vm519_vm5, %v628_v7 }
 0x4e5   : > { %v625_v9 = vpop.f32.mrf.mxu0  ;;  %1653 = vmatprep.mubr.msk.bf16.mxu0 %vm1920_vm2, %v1919_v5 }
 0x4e7   : > { %v1620_v10 = vpop.f32.mrf.mxu0 }
 0x4e8   : > { %v1544_v10 = vld [vmem:[%s2074_s24 + $0xc] sm:$0xf] }
 0x4e9   : > { %v735_v12 = vpop.f32.mrf.mxu0 }
 0x4ea   : > { %v741_v13 = vpack.c.bf16 %v735_v12, %v735_v12 }
 0x4eb   : > { %v1631_v14 = vpop.f32.mrf.mxu0 }
 0x4ec   : > { %1636 = vmatmul.mubr.msk.bf16.vlgmr.msra.gmra.mxu1 %vm519_vm5, %v741_v13 }
 0x4ed   : > { %1646 = vmatpush3.bf16.xpose.msra.mxu1 %v844_v15  ;;  %v738_v16 = vpop.f32.mrf.mxu0  ;;  %1647 = vmatprep.mubr.msk.bf16.mxu1 %vm1920_vm2, %v1919_v5 }
 0x4ee   : > { %1657 = vmatprep.subr.bf16.mxu1 %v1919_v5 }
 0x4ef   : > { %v1632_v17 = vpop.f32.mrf.mxu0 }
 0x4f4   : > { %1648 = vmatmul.mubr.msk.bf16.vlgmr.msra.gmra.mxu1 %vm519_vm5, %v837_v18 }
 0x4f5   : > { %1659 = vmatprep.mubr.msk.bf16.mxu1 %vm1920_vm2, %v1919_v5  ;;  %1658 = vmatpush3.bf16.msra.mxu1 %v954_v50  ;;  %v1790_v50 = vld [vmem:[%s2085_s10 + $0x10] sm:$0xff]  }
 0x4f6   : > { %1669 = vmatprep.subr.bf16.mxu1 %v1919_v5 }
 0x5a4   : > { %v830_v19 = vpop.f32.mrf.mxu0 }
 0x5a6   : > { %v1643_v20 = vpop.f32.mrf.mxu0 }
 0x5a8   : > { %v833_v22 = vpop.f32.mrf.mxu0 }
 0x5aa   : > { %v1644_v23 = vpop.f32.mrf.mxu0 }
 0x5ac   : > { %v784_v24 = vpop.f32.mrf.mxu1 }
 0x5ad   : > { %v2166_v25 = vadd.f32 %v830_v19, %v784_v24 }
 0x5ae   : > { %v1637_v26 = vpop.f32.mrf.mxu1 }
 0x5b0   : > { %v787_v27 = vpop.f32.mrf.mxu1 }
 0x5b2   : > { %v1638_v28 = vpop.f32.mrf.mxu1 }
 0x5b4   : > { %v880_v29 = vpop.f32.mrf.mxu1 }
 0x5b5   : > { %v886_v30 = vmul.f32 0.35355338, %v880_v29 }
 0x5b6   : > { %v1649_v31 = vpop.f32.mrf.mxu1 }
 0x5b7   : > { %v887_v32 = vsel %vm519_vm5, %v886_v30, -inf  ;;  %v1787_v31 = vld [vmem:[%s2079_s14 + $0x8] sm:$0xff]  }
 0x5b8   : > { %888 = vmax.xlane.f32.xlu1 %v887_v32  ;;  %v883_v33 = vpop.f32.mrf.mxu1  ;;  %v1788_v32 = vld [vmem:[%s2079_s14] sm:$0xff]  }
 0x5ba   : > { %v1650_v34 = vpop.f32.mrf.mxu1 }
 0x5c9   : > { %999 = vrot.lane.b32.xlu1 %v2114_v21, %s1928_s26 }
 0x5cd   : > { %997 = vrot.lane.b32.xlu1 %v2114_v21, %s1929_s16 }
 0x641   : > { %v889_v35 = vpop.xlane.xlu1 %888 }
 0x642   : > { %v890_v36 = vsub.f32 %v886_v30, %v889_v35 }
 0x644   : > { %v891_v37 = vmul.f32 1.442695, %v890_v36 }
 0x645   : > { %v1000_v45 = vpop.permute.xlu1 %999 }
 0x646   : > { %1805 = vpow2.f32 %v891_v37  ;;  %v1005_v47 = vsel %vm519_vm5, %v1000_v45, 0 }
 0x649   : > { %v998_v48 = vpop.permute.xlu1 %997 }
 0x653   : > { %v1806_v38 = vpop.eup %1805 }
 0x654   : > { %v893_v39 = vsel %vm519_vm5, %v1806_v38, 0.0 }
 0x655   : > { %894 = vadd.xlane.f32.xlu0 %v893_v39 }
 0x66b   : > { %899 = vrot.lane.b32.xlu0 %v2114_v21, %s1930_s20 }
 0x6de   : > { %v895_v40 = vpop.xlane.xlu0 %894 }
 0x6df   : > { %1807 = vrcp.f32 %v895_v40 }
 0x6e2   : > { %v900_v41 = vpop.permute.xlu0 %899 }
 0x6e3   : > { %v905_v42 = vsel %vm584_vm6, %v900_v41, 0  ;;  %v1546_v41 = vld [vmem:[%s410_s21] ss:$0 sm:$0xff] }
 0x6e4   : > { %1652 = vmatpush3.bf16.msra.mxu0 %v905_v42 }
 0x6e5   : > { %1663 = vmatprep.subr.bf16.mxu0 %v1919_v5 }
 0x6ec   : > { %v1808_v43 = vpop.eup %1807 }
 0x6ed   : > { %v897_v44 = vmul.f32 %v1808_v43, %v1806_v38 }
 0x6ef   : > { %v898_v46 = vpack.c.bf16 %v897_v44, %v897_v44 }
 0x6f1   : > { %1654 = vmatmul.mubr.msk.bf16.vlgmr.msra.gmra.mxu0 %vm519_vm5, %v898_v46 }
 0x6f2   : > { %1664 = vmatpush3.bf16.xpose.msra.mxu0 %v1005_v47  ;;  %1665 = vmatprep.mubr.msk.bf16.mxu0 %vm1920_vm2, %v1919_v5 }
 0x6f3   : > { %1675 = vmatprep.subr.bf16.mxu0 %v1919_v5 }
 0x6f9   : > { %1666 = vmatmul.mubr.msk.bf16.vlgmr.msra.gmra.mxu0 %vm519_vm5, %v998_v48 }
 0x6fa   : > { %1677 = vmatprep.mubr.msk.bf16.mxu0 %vm1920_vm2, %v1919_v5 }
 0x7b1   : > { %v941_v51 = vpop.f32.mrf.mxu0 }
 0x7b2   : > { %v947_v52 = vpack.c.bf16 %v941_v51, %v941_v51  ;;  %v1791_v51 = vld [vmem:[%s2085_s10 + $0x8] sm:$0xff]  }
 0x7b3   : > { %v1655_v53 = vpop.f32.mrf.mxu0 }
 0x7b4   : > { %1660 = vmatmul.mubr.msk.bf16.vlgmr.msra.gmra.mxu1 %vm519_vm5, %v947_v52  ;;  %v1792_v52 = vld [vmem:[%s2085_s10] sm:$0xff]  }
 0x7b5   : > { %v944_v54 = vpop.f32.mrf.mxu0  ;;  %1671 = vmatprep.mubr.msk.bf16.mxu1 %vm1920_vm2, %v1919_v5 }
 0x7b7   : > { %v1656_v55 = vpop.f32.mrf.mxu0 }
 0x7b9   : > { %v1041_v56 = vpop.f32.mrf.mxu0 }
 0x7ba   : > { %v1047_v57 = vmul.f32 0.35355338, %v1041_v56 }
 0x7bb   : > { %v1667_v58 = vpop.f32.mrf.mxu0 }
 0x7bc   : > { %v1048_v59 = vsel %vm519_vm5, %v1047_v57, -inf }
 0x7bd   : > { %1049 = vmax.xlane.f32.xlu0 %v1048_v59  ;;  %v1044_v60 = vpop.f32.mrf.mxu0 }
 0x7bf   : > { %v1668_v61 = vpop.f32.mrf.mxu0 }
 0x7d3   : > { %1060 = vrot.lane.b32.xlu0 %v2114_v21, %s1931_s8  ;;  %v1115_v21 = vsel %vm584_vm6, %v1544_v10, 0 }
 0x7d4   : > { %1676 = vmatpush3.bf16.msra.mxu0 %v1115_v21 }
 0x7d5   : > { %1689 = vmatprep.subr.bf16.mxu0 %v1919_v5 }
 0x846   : > { %v1050_v62 = vpop.xlane.xlu0 %1049 }
 0x847   : > { %v1051_v63 = vsub.f32 %v1047_v57, %v1050_v62 }
 0x849   : > { %v1052_v0 = vmul.f32 1.442695, %v1051_v63 }
 0x84a   : > { %v1061_v2 = vpop.permute.xlu0 %1060 }
 0x84b   : > { %1809 = vpow2.f32 %v1052_v0  ;;  %v1066_v3 = vsel %vm584_vm6, %v1061_v2, 0 }
 0x84c   : > { %1670 = vmatpush3.bf16.msra.mxu1 %v1066_v3 }
 0x84d   : > { %1681 = vmatprep.subr.bf16.mxu1 %v1919_v5 }
 0x858   : > { %v1810_v4 = vpop.eup %1809 }
 0x859   : > { %v1054_v6 = vsel %vm519_vm5, %v1810_v4, 0.0 }
 0x85a   : > { %1055 = vadd.xlane.f32.xlu1 %v1054_v6 }
 0x874   : > { %v990_v7 = vpop.f32.mrf.mxu1 }
 0x875   : > { %v996_v8 = vadd.f32 %v990_v7, %v2166_v25 }
 0x876   : > { %v1661_v9 = vpop.f32.mrf.mxu1 }
 0x878   : > { %v993_v11 = vpop.f32.mrf.mxu1 }
 0x87a   : > { %v1662_v12 = vpop.f32.mrf.mxu1 }
 0x8e3   : > { %v1056_v13 = vpop.xlane.xlu1 %1055 }
 0x8e4   : > { %1811 = vrcp.f32 %v1056_v13 }
 0x8f1   : > { %v1812_v14 = vpop.eup %1811 }
 0x8f2   : > { %v1058_v15 = vmul.f32 %v1812_v14, %v1810_v4 }
 0x8f4   : > { %v1059_v16 = vpack.c.bf16 %v1058_v15, %v1058_v15 }
 0x8f6   : > { %1672 = vmatmul.mubr.msk.bf16.vlgmr.msra.gmra.mxu1 %vm519_vm5, %v1059_v16 }
 0x8f7   : > { %1685 = vmatprep.mubr.msk.bf16.mxu1 %vm1920_vm2, %v1919_v5  ;;  %1682 = vmatpush3.bf16.msra.mxu1 %v1787_v31 }
 0x8f8   : > { %1683 = vmatprep.subr.bf16.mxu1 %v1919_v5 }
 0x8fb   : > { %1684 = vmatpush3.bf16.msra.mxu1 %v1788_v32 }
 0x9b6   : > { %v1102_v17 = vpop.f32.mrf.mxu1 }
 0x9b7   : > { %v1108_v18 = vpack.c.bf16 %v1102_v17, %v1102_v17 }
 0x9b8   : > { %v1673_v19 = vpop.f32.mrf.mxu1 }
 0x9b9   : > { %1678 = vmatmul.mubr.msk.bf16.vlgmr.msra.gmra.mxu0 %vm519_vm5, %v1108_v18 }
 0x9ba   : > { %v1105_v20 = vpop.f32.mrf.mxu1  ;;  %1697 = vmatprep.mubr.msk.bf16.mxu0 %vm1920_vm2, %v1919_v5  ;;  %1690 = vmatpush3.bf16.msra.mxu0 %v1789_v49 }
 0x9bb   : > { %1691 = vmatprep.subr.bf16.mxu0 %v1919_v5 }
 0x9bc   : > { %v1674_v22 = vpop.f32.mrf.mxu1 }
 0x9be   : > { %1692 = vmatpush3.bf16.msra.mxu0 %v1790_v50 }
 0x9bf   : > { %1693 = vmatprep.subr.bf16.mxu0 %v1919_v5 }
 0x9c2   : > { %1694 = vmatpush3.bf16.msra.mxu0 %v1791_v51 }
 0x9c3   : > { %1695 = vmatprep.subr.bf16.mxu0 %v1919_v5 }
 0x9c6   : > { %1696 = vmatpush3.bf16.msra.mxu0 %v1792_v52 }
 0xa79   : > { %v1151_v23 = vpop.f32.mrf.mxu0 }
 0xa7a   : > { %v1157_v24 = vadd.f32 %v1151_v23, %v996_v8 }
 0xa7b   : > { %v1679_v25 = vpop.f32.mrf.mxu0 }
 0xa7c   : > { %v1158_v26 = vadd.f32 %v1157_v24, %v2092_v1 }
 0xa7d   : > { %v1154_v27 = vpop.f32.mrf.mxu0 }
 0xa7e   : > { %v1160_v28 = vmul.f32 %v1158_v26, %v1158_v26 }
 0xa7f   : > { %v1680_v29 = vpop.f32.mrf.mxu0 }
 0xa80   : > { %v1161_v30 = vsel %vm432_vm1, %v1160_v28, 0.0 }
 0xa81   : > { %1162 = vadd.xlane.f32.xlu1 %v1161_v30 }
 0xb0a   : > { %v1163_v33 = vpop.xlane.xlu1 %1162 }
 0xb0b   : > { %v1164_v34 = vmul.f32 0.03125, %v1163_v33 }
 0xb0d   : > { %1813 = vrsqrt.f32 %v1164_v34  ;;  %vm1167_vm7 = vcmp.eq.f32.partialorder %v1164_v34, inf  ;;  %v1170_v1 = vand.u32 2147483648, %v1164_v34  ;;  %vm1169_vm8 = vcmp.eq.f32.partialorder %v1164_v34, 0.0 }
 0xb1a   : > { %v1814_v35 = vpop.eup %1813 }
 0xb1b   : > { %v1166_v36 = vmul.f32 %v1814_v35, %v1164_v34 }
 0xb1d   : > { %v1168_v37 = vsel %vm1167_vm7, %v1164_v34, %v1166_v36 }
 0xb1e   : > { %v1171_v38 = vsel %vm1169_vm8, %v1170_v1, %v1168_v37 }
 0xb1f   : > { %v1172_v39 = vadd.f32 1e-05, %v1171_v38 }
 0xb21   : > { %1815 = vrcp.f32 %v1172_v39 }
 0xb2e   : > { %v1816_v40 = vpop.eup %1815 }
 0xb2f   : > { %v1174_v42 = vmul.f32 %v1816_v40, %v1158_v26 }
 0xb31   : > { %v1181_v43 = vmul.f32 %v1546_v41, %v1174_v42 }
 0xb33   : > { %v1182_v44 = vpack.c.bf16 %v1181_v43, %v1181_v43 }
 0xb35   : > { %1686 = vmatmul.mubr.msk.bf16.vlgmr.msra.gmra.mxu1 %vm432_vm1, %v1182_v44 }
 0xbf5   : > { %v1236_v45 = vpop.f32.mrf.mxu1 }
 0xbf6   : > { %1243 = vrot.lane.b32.xlu1 %v1236_v45, %s1925_s23 }
 0xbf7   : > { %v1687_v46 = vpop.f32.mrf.mxu1 }
 0xbf9   : > { %v1239_v47 = vpop.f32.mrf.mxu1 }
 0xbfb   : > { %v1688_v48 = vpop.f32.mrf.mxu1 }
 0xc68   : > { %v1244_v53 = vpop.permute.xlu1 %1243 }
 0xc69   : > { %v1246_v54 = vmul.f32 %v1244_v53, %v1236_v45 }
 0xc6b   : > { %v1550_v55 = vmul.f32 -1.442695, %v1246_v54 }
 0xc6d   : > { %1817 = vpow2.f32 %v1550_v55 }
 0xc7a   : > { %v1818_v56 = vpop.eup %1817 }
 0xc7b   : > { %v1250_v57 = vadd.f32 1.0, %v1818_v56 }
 0xc7d   : > { %1819 = vrcp.f32 %v1250_v57 }
 0xc8a   : > { %v1820_v58 = vpop.eup %1819 }
 0xc8b   : > { %v1253_v59 = vmul.f32 %v1820_v58, %v1246_v54 }
 0xc8d   : > { %v1254_v60 = vpack.c.bf16 %v1253_v59, %v1253_v59 }
 0xc8f   : > { %1698 = vmatmul.mubr.msk.bf16.vlgmr.msra.gmra.mxu0 %vm1287_vm9, %v1254_v60 }
 0xd4f   : > { %v1325_v61 = vpop.f32.mrf.mxu0 }
 0xd50   : > { %v1331_v62 = vadd.f32 %v1325_v61, %v1158_v26 }
 0xd51   : > { %v1699_v63 = vpop.f32.mrf.mxu0  ;;  %1336 = sbr.rel (%p1556_p1) target bundleno = 3596 (0xe0c), region = 60 }
 0xd52   : > { %1332 = vst.msk [vmem:[%s2087_s22] sm:$0xff] %vm432_vm1, %v1331_v62 }
 0xd53   : > { %v1328_v5 = vpop.f32.mrf.mxu0 }
 0xd55   : > { %v1700_v0 = vpop.f32.mrf.mxu0 }
 0xd56   : > { %v1338_v2 = vmul.f32 %v1331_v62, %v1331_v62  ;;  %v1557_v13 = vld [vmem:[%s2286_s7] ss:$0 sm:$0xff] }
 0xd58   : > { %v1339_v3 = vsel %vm432_vm1, %v1338_v2, 0.0 }
 0xd59   : > { %1340 = vadd.xlane.f32.xlu0 %v1339_v3 }
 0xde2   : > { %v1341_v4 = vpop.xlane.xlu0 %1340 }
 0xde3   : > { %v1342_v6 = vmul.f32 0.03125, %v1341_v4 }
 0xde5   : > { %1821 = vrsqrt.f32 %v1342_v6  ;;  %vm1345_vm10 = vcmp.eq.f32.partialorder %v1342_v6, inf  ;;  %v1348_v9 = vand.u32 2147483648, %v1342_v6  ;;  %vm1347_vm11 = vcmp.eq.f32.partialorder %v1342_v6, 0.0 }
 0xdf2   : > { %v1822_v7 = vpop.eup %1821 }
 0xdf3   : > { %v1344_v8 = vmul.f32 %v1822_v7, %v1342_v6 }
 0xdf5   : > { %v1346_v10 = vsel %vm1345_vm10, %v1342_v6, %v1344_v8 }
 0xdf6   : > { %v1349_v21 = vsel %vm1347_vm11, %v1348_v9, %v1346_v10 }
 0xdf7   : > { %v1350_v11 = vadd.f32 1e-05, %v1349_v21 }
 0xdf9   : > { %1823 = vrcp.f32 %v1350_v11 }
 0xe06   : > { %v1824_v12 = vpop.eup %1823 }
 0xe07   : > { %v1352_v14 = vmul.f32 %v1824_v12, %v1331_v62 }
 0xe09   : > { %v1359_v15 = vmul.f32 %v1557_v13, %v1352_v14 }
 0xe0b   : > { %1360 = vst.msk [vmem:[%s2087_s22] sm:$0xff] %vm432_vm1, %v1359_v15 }
 0xe0c PF: > { %s1559_s25 = sshll.u32 %s1905_s9, 7  ;;  %s2311_s29 = sld [smem:[#allocation14_spill]] }
 0xe0d   : > { %s1375_s12 = sshll.u32 %s2087_s22, 4  ;;  %s2313_s18 = sand.u32 1, %s1893_s28   ;;  %s1376_s12 = int_to_ptr.vmem [resolvable:$true] %s1375_s12 }
 0xe0e   : > { %s1362_s23 = scalar_lea.sflag [#allocation3], %s2313_s18  ;;  %s1825_s19 = scalar_lea.vmem %s1376_s12, 128 }
 0xe0f   : > { %p1826_p2 = scmp.ne.s32.totalorder %s1376_s12, %s1825_s19  ;;  %s1932_s13 = smov [#allocation2]  }
 0xe10   : > { %s1829_s26 = sshll.u32 %s1932_s13, 4  ;;  %s1830_s26 = int_to_ptr.vmem [resolvable:$false] %s1829_s26 }
 0xe11   : > { %p1827_p4 = pnand %p1826_p2, %p2027_p3  ;;  %s1831_s16 = scalar_lea.vmem %s1830_s26, 256 }
 0xe12   : > { %s2312_s15 = smov %s2311_s29  ;;  %s1373_s11 = scalar_lea.hbm %s2311_s29, %s1559_s25 }
 0xe13   : > { %p1828_p5 = pneg %p1827_p4  ;;  %p1832_p6 = scmp.lt.s32.totalorder %s1376_s12, %s1830_s26 }
 0xe14   : > { %p1833_p7 = scmp.lt.s32.totalorder %s1831_s16, %s1825_s19 }
 0xe16   : > { %p1834_p8 = por %p1833_p7, %p1832_p6 }
 0xe18   : > { %p1835_p10 = pnand %p1834_p8, %p1828_p5 }
 0xe1a   : > { %1838 = shalt.err (!%p1835_p10)
}
 0xe1b   : > { %s1839_s9 = scalar_lea.hbm %s1373_s11, 128  ;;  %s1843_s8 = scalar_lea.hbm %s2312_s15, 256 }
 0xe1c   : > { %p1840_p11 = scmp.ne.s32.totalorder %s1373_s11, %s1839_s9  ;;  %p1844_p0 = scmp.lt.s32.totalorder %s1373_s11, %s2312_s15 }
 0xe1d   : > { %p1845_p1 = scmp.lt.s32.totalorder %s1843_s8, %s1839_s9 }
 0xe1e   : > { %p1841_p12 = pnand %p1840_p11, %p2027_p3 }
 0xe1f   : > { %p1846_p2 = por %p1845_p1, %p1844_p0 }
 0xe20   : > { %p1842_p13 = pneg %p1841_p12 }
 0xe22   : > { %p1847_p4 = pnand %p1846_p2, %p1842_p13 }
 0xe24   : > { %1850 = shalt.err (!%p1847_p4)
}
 0xe25   : > { %1701 = dma.vmem_to_hbm [thread:$0]  (%p2027_p3), %s1376_s12, 128, %s1373_s11, %s1362_s23  }
 0xe26 PF: > { %s2314_s30 = sld [smem:[#allocation9_spill]] }
 0xe27   : > { %s2315_s21 = sld [smem:[#allocation5_spill]] }
 0xe2c   : > { %p1707_p5 = scmp.ge.s32.totalorder %s2314_s30, 2 }
 0xe2d   : > { %s1387_s10 = sand.u32 1, %s2315_s21  }
 0xe2e   : > { %p1704_p6 = pnand %p1707_p5, %p2037_p9  ;;  %s1388_s27 = scalar_lea.sflag [#allocation3], %s1387_s10 }
 0xe30   : > { %p1705_p7 = pneg %p1704_p6 }
 0xe32   : > { %1884 = dma.done.wait (%p1705_p7), %s1388_s27, 128  }
 0xe33   : > { %1886 = vsyncadd (%p1705_p7), %s1388_s27, 4294967168  ;;  %s21_s12 = sadd.s32 1, %s2314_s30   ;;  %s2317_s29 = sld [smem:[#allocation6_spill]] }
 0xe34   : > { %p18_p8 = scmp.ge.s32.totalorder %s21_s12, 6   ;;  %s2318_s18 = sld [smem:[#allocation13_spill]] }
 0xe35   : > { %s2319_s30 = sld [smem:[#allocation7_spill]]  ;;  %s2323_s27 = smov %s1893_s28 }
 0xe36   : > { %s2320_s9 = sld [smem:[#allocation8_spill]]  ;;  %20 = sbr.rel (!%p18_p8) target bundleno = 7 (0x7), region = 116 }
 0xe37   : > { %s2321_s10 = sld [smem:[#allocation10_spill]] }
 0xe38   : > { %s2322_s11 = sld [smem:[#allocation11_spill]] }
 0xe39   : > { %s2324_s28 = smov %s2317_s29 }
 0xe3a   : > { %s2325_s29 = smov %s2318_s18 }
 0xe3b   :  { %1393 = vsyncpa [#allocation3], 1 }
 0xe3c   :  { %1395 = vsyncpa [#allocation3 + $0x1], 1 }

</bundles_post_ra>
